<compile_context>
chip_gen: v7x
topology: tpu7x:2x2x1
jax: 0.10.0
libtpu: 0.0.40
codegen_flags: <defaults>
</compile_context>

<pallas_src>
import math
import functools

import jax
import jax.numpy as jnp
from jax import lax
from jax.experimental import pallas as pl
from jax.experimental.pallas import tpu as pltpu


# --------------------------------------------------------------------------- #
# Hardware-aware helpers
# --------------------------------------------------------------------------- #
def _vmem_capacity_bytes():
    """Physical VMEM of the local TPU; falls back to 128 MiB if unqueryable."""
    try:
        cap = getattr(pltpu.get_tpu_info(), "vmem_capacity_bytes", None)
        if cap:
            return int(cap)
    except Exception:
        pass
    return 128 << 20


def _pick_heads_per_group(num_heads, head_dim, max_lanes):
    """Largest divisor g of num_heads with g*head_dim <= max_lanes.

    Multi-group configs additionally require g*head_dim % 128 == 0 so that the
    per-group column writes into the (S, H) scratch stay lane-tile aligned.
    Falls back to a single group (all heads) if no aligned grouping fits.
    """
    best = None
    for g in range(1, num_heads + 1):
        if num_heads % g:
            continue
        ghd = g * head_dim
        if ghd > max_lanes:
            continue
        if g != num_heads and ghd % 128 != 0:
            continue
        best = g
    return best if best is not None else num_heads


# --------------------------------------------------------------------------- #
# Kernel
# --------------------------------------------------------------------------- #
def _attn_kernel(x_ref, wqkv_ref, bqkv_ref, wo_ref, bo_ref, o_ref, scratch_ref,
                 *, head_dim, heads_per_group, compute_dtype, approx_recip,
                 slice_wo):
    g = pl.program_id(1)
    G = heads_per_group
    hd = head_dim
    ghd = G * hd
    H = o_ref.shape[-1]

    contract_last = (((1,), (1,)), ((), ()))  # y = a @ b.T (contract last dims)

    x = x_ref[0]                       # (S, H)       compute_dtype
    wqkv = wqkv_ref[0]                 # (3*ghd, H)   compute_dtype
    bqkv = bqkv_ref[0]                 # (1, 3*ghd)   f32

    # Fused QKV projection for this head group: one wide-N MXU matmul.
    qkv = lax.dot_general(x, wqkv, contract_last,
                          preferred_element_type=jnp.float32) + bqkv   # (S, 3*ghd) f32

    scale = 1.0 / math.sqrt(hd)
    q = qkv[:, 0 * ghd:1 * ghd] * scale       # scale folded into q (S*ghd elems)
    k = qkv[:, 1 * ghd:2 * ghd]
    v = qkv[:, 2 * ghd:3 * ghd]

    if slice_wo:
        # scratch is the (S, H) f32 *output* accumulator in this mode.
        @pl.when(g == 0)
        def _():
            scratch_ref[...] = jnp.zeros_like(scratch_ref)

    ctxs = []  # only used on the small-head_dim concat path
    for h in range(G):
        sl = slice(h * hd, (h + 1) * hd)
        qh = q[:, sl].astype(compute_dtype)              # (S, hd)
        kh = k[:, sl].astype(compute_dtype)
        vh = v[:, sl].astype(compute_dtype)

        s = lax.dot_general(qh, kh, contract_last,
                            preferred_element_type=jnp.float32)        # (S, S) f32
        m = jnp.max(s, axis=-1, keepdims=True)
        p = jnp.exp(s - m)                                             # unnormalized
        inv = pl.reciprocal(jnp.sum(p, axis=-1, keepdims=True),
                            approx=approx_recip)                       # EUP when approx
        # Fold the softmax normalization into the (S, hd) context instead of the
        # (S, S) probabilities: far fewer VPU multiplies, one fewer live (S, S) temp.
        ctx_h = jnp.dot(p.astype(compute_dtype), vh,
                        preferred_element_type=jnp.float32) * inv      # (S, hd) f32

        if slice_wo:
            # Partial output projection for this head: acc += ctx_h @ Wo[:, cols].T
            wo_h = wo_ref[:, sl]                                       # (H, hd)
            scratch_ref[...] += lax.dot_general(
                ctx_h.astype(compute_dtype), wo_h, contract_last,
                preferred_element_type=jnp.float32)
        elif hd % 128 == 0:
            # Direct, lane-aligned store of this head's context columns (no concat,
            # bounded live ranges per head).
            col = pl.multiple_of(g * ghd + h * hd, 128)
            scratch_ref[:, pl.ds(col, hd)] = ctx_h
        else:
            ctxs.append(ctx_h)

    if (not slice_wo) and (hd % 128 != 0):
        ctx_g = jnp.concatenate(ctxs, axis=-1)                         # (S, ghd) f32
        if ghd == H:
            scratch_ref[...] = ctx_g
        else:
            col0 = pl.multiple_of(g * ghd, 128)                        # ghd % 128 == 0
            scratch_ref[:, pl.ds(col0, ghd)] = ctx_g

    @pl.when(g == pl.num_programs(1) - 1)
    def _():
        if slice_wo:
            out = scratch_ref[...] + bo_ref[...]
        else:
            ctx = scratch_ref[...].astype(compute_dtype)               # (S, H)
            out = lax.dot_general(ctx, wo_ref[...], contract_last,
                                  preferred_element_type=jnp.float32) + bo_ref[...]
        o_ref[0] = out.astype(o_ref.dtype)


# --------------------------------------------------------------------------- #
# Wrappers
# --------------------------------------------------------------------------- #
def prepare_params(params, num_heads, *, heads_per_group=None,
                   compute_dtype=jnp.bfloat16, max_lanes=None):
    """Fuse / re-layout the nn.Linear weights ONCE (hoist out of the step path).

    Returns (fused_params, heads_per_group).
    """
    H = params["wq"].shape[0]
    assert H % num_heads == 0
    hd = H // num_heads

    if max_lanes is None:
        # Generation-aware group cap: smaller on 64-MiB-VMEM parts (v7x).
        max_lanes = 256 if _vmem_capacity_bytes() <= (64 << 20) else 512
    if heads_per_group is None:
        heads_per_group = _pick_heads_per_group(num_heads, hd, max_lanes)
    assert num_heads % heads_per_group == 0
    G = heads_per_group
    num_groups = num_heads // G
    ghd = G * hd
    assert num_groups == 1 or ghd % 128 == 0, (
        "multi-group configs need 128-aligned group width (heads_per_group*head_dim)")

    wq = params["wq"].reshape(num_groups, ghd, H)
    wk = params["wk"].reshape(num_groups, ghd, H)
    wv = params["wv"].reshape(num_groups, ghd, H)
    wqkv = jnp.concatenate([wq, wk, wv], axis=1).astype(compute_dtype)  # (ng, 3*ghd, H)

    bq = params["bq"].reshape(num_groups, 1, ghd)
    bk = params["bk"].reshape(num_groups, 1, ghd)
    bv = params["bv"].reshape(num_groups, 1, ghd)
    bqkv = jnp.concatenate([bq, bk, bv], axis=2).astype(jnp.float32)    # (ng, 1, 3*ghd)

    fused = {
        "wqkv": wqkv,
        "bqkv": bqkv,
        "wo": params["wo"].astype(compute_dtype),                       # (H, H)
        "bo": params["bo"].reshape(1, H).astype(jnp.float32),
    }
    return fused, G


def self_attention_fused(x, fused, num_heads, heads_per_group, *,
                         compute_dtype=jnp.bfloat16, out_dtype=None,
                         slice_wo=None):
    B, S, H = x.shape
    assert H % num_heads == 0
    hd = H // num_heads
    G = heads_per_group
    num_groups = num_heads // G
    ghd = G * hd
    out_dtype = x.dtype if out_dtype is None else out_dtype
    approx_recip = (compute_dtype != jnp.float32)

    compute_bytes = jnp.dtype(compute_dtype).itemsize
    out_bytes = jnp.dtype(out_dtype).itemsize
    vmem_cap = _vmem_capacity_bytes()

    if slice_wo is None:
        # Keep Wo resident when it fits comfortably; otherwise K-slice it per group
        # and accumulate partial output projections (needed for huge H on v7x).
        slice_wo = H * H * compute_bytes > vmem_cap // 4

    # Explicit VMEM limit from the actual footprint (default scoped VMEM is only
    # 16/32 MiB and breaks first at realistic S/H), clamped per generation.
    fp = 0
    fp += 2 * S * H * compute_bytes                 # x block (double-buffered)
    fp += 2 * S * H * out_bytes                     # out block (double-buffered)
    fp += 2 * 3 * ghd * H * compute_bytes           # fused Wqkv block
    fp += 2 * 3 * ghd * 4                           # fused bqkv block
    fp += (2 * H * ghd if slice_wo else H * H) * compute_bytes   # Wo
    fp += H * 4                                     # bo (single-buffered)
    fp += S * H * 4                                 # (S, H) f32 scratch
    fp += S * 3 * ghd * 4 + 3 * S * S * 4 + 2 * S * ghd * 4      # in-kernel temps
    vmem_limit = int(fp * 1.3) + (2 << 20)
    vmem_limit = max(vmem_limit, 32 << 20)
    vmem_limit = min(vmem_limit, int(vmem_cap * 0.75))

    x_in = x.astype(compute_dtype)

    if slice_wo:
        wo_spec = pl.BlockSpec((H, ghd), lambda b, g: (0, g))   # per-group K-slice
    else:
        wo_spec = pl.BlockSpec((H, H), lambda b, g: (0, 0),
                               pipeline_mode=pl.Buffered(1))    # resident, 1 buffer

    kernel = functools.partial(
        _attn_kernel, head_dim=hd, heads_per_group=G,
        compute_dtype=compute_dtype, approx_recip=approx_recip,
        slice_wo=slice_wo)

    return pl.pallas_call(
        kernel,
        out_shape=jax.ShapeDtypeStruct((B, S, H), out_dtype),
        grid_spec=pltpu.PrefetchScalarGridSpec(
            num_scalar_prefetch=0,
            grid=(B, num_groups),
            in_specs=[
                pl.BlockSpec((1, S, H), lambda b, g: (b, 0, 0)),        # x
                pl.BlockSpec((1, 3 * ghd, H), lambda b, g: (g, 0, 0)),  # fused Wqkv
                pl.BlockSpec((1, 1, 3 * ghd), lambda b, g: (g, 0, 0)),  # fused bqkv
                wo_spec,                                                # Wo
                pl.BlockSpec((1, H), lambda b, g: (0, 0),
                             pipeline_mode=pl.Buffered(1)),             # bo
            ],
            out_specs=pl.BlockSpec((1, S, H), lambda b, g: (b, 0, 0)),
            scratch_shapes=[pltpu.VMEM((S, H), jnp.float32)],
        ),
        compiler_params=pltpu.CompilerParams(
            dimension_semantics=("parallel", "arbitrary"),
            vmem_limit_bytes=vmem_limit),
    )(x_in, fused["wqkv"], fused["bqkv"], fused["wo"], fused["bo"])


def self_attention(x, params, num_heads, *, heads_per_group=None,
                   compute_dtype=jnp.bfloat16, out_dtype=None, slice_wo=None):
    """Convenience wrapper.  In a real model, call prepare_params() once at
    parameter-load time and reuse the fused weights across steps."""
    fused, G = prepare_params(params, num_heads, heads_per_group=heads_per_group,
                              compute_dtype=compute_dtype)
    return self_attention_fused(x, fused, num_heads, G,
                                compute_dtype=compute_dtype,
                                out_dtype=out_dtype, slice_wo=slice_wo)


# --------------------------------------------------------------------------- #
# Reference & test harness
# --------------------------------------------------------------------------- #
def _reference(x, params, num_heads):
    """Pure-JAX reference mirroring the PyTorch forward (eval mode, mask=None)."""
    B, S, H = x.shape
    hd = H // num_heads
    q = x @ params["wq"].T + params["bq"]
    k = x @ params["wk"].T + params["bk"]
    v = x @ params["wv"].T + params["bv"]
    q = q.reshape(B, S, num_heads, hd).transpose(0, 2, 1, 3)
    k = k.reshape(B, S, num_heads, hd).transpose(0, 2, 1, 3)
    v = v.reshape(B, S, num_heads, hd).transpose(0, 2, 1, 3)
    scores = jnp.einsum("bhqd,bhkd->bhqk", q, k) / math.sqrt(hd)
    attn = jax.nn.softmax(scores, axis=-1)
    ctx = jnp.einsum("bhqk,bhkd->bhqd", attn, v)
    ctx = ctx.transpose(0, 2, 1, 3).reshape(B, S, H)
    return ctx @ params["wo"].T + params["bo"]


def _init_params(key, hidden_dim):
    """Deterministic nn.Linear-style init: U(-1/sqrt(fan_in), 1/sqrt(fan_in))."""
    bound = 1.0 / math.sqrt(hidden_dim)
    names = ["wq", "bq", "wk", "bk", "wv", "bv", "wo", "bo"]
    keys = jax.random.split(key, len(names))
    params = {}
    for name, k in zip(names, keys):
        shape = (hidden_dim, hidden_dim) if name.startswith("w") else (hidden_dim,)
        params[name] = jax.random.uniform(
            k, shape, jnp.float32, minval=-bound, maxval=bound)
    return params


if __name__ == "__main__":
    root = jax.random.PRNGKey(0)

    def check(case_id, B, S, H, num_heads, atol, rtol, **kw):
        kx, kp = jax.random.split(jax.random.fold_in(root, case_id))
        x = jax.random.normal(kx, (B, S, H), jnp.float32)
        params = _init_params(kp, H)
        ref = _reference(x, params, num_heads)
        out = jax.block_until_ready(self_attention(x, params, num_heads, **kw))
        assert out.shape == (B, S, H)
        err = float(jnp.max(jnp.abs(out.astype(jnp.float32) - ref)))
        assert jnp.allclose(out.astype(jnp.float32), ref, atol=atol, rtol=rtol), (
            case_id, err)

    # 1) Module-scale shapes, f32 MXU path.
    check(1, 2, 8, 32, 8, 5e-3, 5e-3, compute_dtype=jnp.float32)
    # 2) Same shapes, bf16 MXU perf path (looser tolerance).
    check(2, 2, 8, 32, 8, 3e-2, 3e-2)
    # 3) Multi-head-group grid + lane-aligned direct context stores (head_dim=128).
    check(3, 1, 128, 256, 2, 3e-2, 3e-2, heads_per_group=1)
    # 4) K-sliced Wo with per-group output-projection accumulation path.
    check(4, 1, 128, 256, 2, 3e-2, 3e-2, heads_per_group=1, slice_wo=True)
    # 5) Multi-group concat path (head_dim=64 < 128, lane-aligned group width).
    check(5, 1, 64, 256, 4, 3e-2, 3e-2, heads_per_group=2)

    print("KERNEL_OK")
</pallas_src>

<mosaic_0001>
module attributes {stable_mosaic.version = 11 : i64} {
  func.func @_attn_kernel(%arg0: i32, %arg1: i32, %arg2: memref<1x8x32xf32, #tpu.memory_space<vmem>>, %arg3: memref<1x96x32xf32, #tpu.memory_space<vmem>>, %arg4: memref<1x1x96xf32, #tpu.memory_space<vmem>>, %arg5: memref<32x32xf32, #tpu.memory_space<vmem>>, %arg6: memref<1x32xf32, #tpu.memory_space<vmem>>, %arg7: memref<1x8x32xf32, #tpu.memory_space<vmem>>, %arg8: memref<8x32xf32, #tpu.memory_space<vmem>>) attributes {dimension_semantics = [#tpu.dimension_semantics<parallel>, #tpu.dimension_semantics<arbitrary>], iteration_bounds = array<i64: 2, 1>, scalar_prefetch = 0 : i64, scratch_operands = 1 : i64, tpu.core_type = #tpu.core_type<tc>, window_params = [{transform_indices = @transform_0, window_bounds = array<i64: 1, 8, 32>}, {transform_indices = @transform_1, window_bounds = array<i64: 1, 96, 32>}, {transform_indices = @transform_2, window_bounds = array<i64: 1, 1, 96>}, {pipeline_mode = #tpu.pipeline_mode<synchronous>, transform_indices = @transform_3, window_bounds = array<i64: 32, 32>}, {pipeline_mode = #tpu.pipeline_mode<synchronous>, transform_indices = @transform_4, window_bounds = array<i64: 1, 32>}, {transform_indices = @transform_5, window_bounds = array<i64: 1, 8, 32>}]} {
    %c0 = arith.constant 0 : index
    %c0_0 = arith.constant 0 : index
    %c0_1 = arith.constant 0 : index
    %0 = vector.load %arg2[%c0, %c0_0, %c0_1] : memref<1x8x32xf32, #tpu.memory_space<vmem>>, vector<1x8x32xf32>
    %1 = vector.shape_cast %0 : vector<1x8x32xf32> to vector<8x32xf32>
    %c0_2 = arith.constant 0 : index
    %c0_3 = arith.constant 0 : index
    %c0_4 = arith.constant 0 : index
    %2 = vector.load %arg3[%c0_2, %c0_3, %c0_4] : memref<1x96x32xf32, #tpu.memory_space<vmem>>, vector<1x96x32xf32>
    %3 = vector.shape_cast %2 : vector<1x96x32xf32> to vector<96x32xf32>
    %c0_5 = arith.constant 0 : index
    %c0_6 = arith.constant 0 : index
    %c0_7 = arith.constant 0 : index
    %4 = vector.load %arg4[%c0_5, %c0_6, %c0_7] : memref<1x1x96xf32, #tpu.memory_space<vmem>>, vector<1x1x96xf32>
    %5 = vector.shape_cast %4 : vector<1x1x96xf32> to vector<1x96xf32>
    %cst = arith.constant dense<0.000000e+00> : vector<8x96xf32>
    %6 = tpu.matmul %1, %3, %cst {dimension_numbers = #tpu.dot_dimension_numbers<[1], [1], [0], [0], [0, 0, 1, 0], [], []>} : vector<8x32xf32>, vector<96x32xf32>, vector<8x96xf32> -> vector<8x96xf32>
    %7 = vector.broadcast %5 : vector<1x96xf32> to vector<8x96xf32>
    %8 = arith.addf %6, %7 : vector<8x96xf32>
    %9 = vector.extract_strided_slice %8 {offsets = [0, 0], sizes = [8, 32], strides = [1, 1]} : vector<8x96xf32> to vector<8x32xf32>
    %cst_8 = arith.constant 5.000000e-01 : f32
    %10 = vector.broadcast %cst_8 : f32 to vector<8x32xf32>
    %11 = arith.mulf %9, %10 : vector<8x32xf32>
    %12 = vector.extract_strided_slice %8 {offsets = [0, 32], sizes = [8, 32], strides = [1, 1]} : vector<8x96xf32> to vector<8x32xf32>
    %13 = vector.extract_strided_slice %8 {offsets = [0, 64], sizes = [8, 32], strides = [1, 1]} : vector<8x96xf32> to vector<8x32xf32>
    %14 = vector.extract_strided_slice %11 {offsets = [0, 0], sizes = [8, 4], strides = [1, 1]} : vector<8x32xf32> to vector<8x4xf32>
    %15 = vector.extract_strided_slice %12 {offsets = [0, 0], sizes = [8, 4], strides = [1, 1]} : vector<8x32xf32> to vector<8x4xf32>
    %16 = vector.extract_strided_slice %13 {offsets = [0, 0], sizes = [8, 4], strides = [1, 1]} : vector<8x32xf32> to vector<8x4xf32>
    %cst_9 = arith.constant dense<0.000000e+00> : vector<8x8xf32>
    %17 = tpu.matmul %14, %15, %cst_9 {dimension_numbers = #tpu.dot_dimension_numbers<[1], [1], [0], [0], [0, 0, 1, 0], [], []>} : vector<8x4xf32>, vector<8x4xf32>, vector<8x8xf32> -> vector<8x8xf32>
    %cst_10 = arith.constant dense<0xFF800000> : vector<8xf32>
    %18 = vector.multi_reduction <maximumf>, %17, %cst_10 [1] : vector<8x8xf32> to vector<8xf32>
    %19 = vector.shape_cast %18 : vector<8xf32> to vector<8x1xf32>
    %20 = vector.broadcast %19 : vector<8x1xf32> to vector<8x8xf32>
    %21 = arith.subf %17, %20 : vector<8x8xf32>
    %22 = math.exp %21 : vector<8x8xf32>
    %cst_11 = arith.constant dense<0.000000e+00> : vector<8xf32>
    %23 = vector.multi_reduction <add>, %22, %cst_11 [1] : vector<8x8xf32> to vector<8xf32>
    %24 = vector.shape_cast %23 : vector<8xf32> to vector<8x1xf32>
    %25 = tpu.reciprocal %24 : vector<8x1xf32> -> vector<8x1xf32>
    %cst_12 = arith.constant dense<0.000000e+00> : vector<8x4xf32>
    %26 = tpu.matmul %22, %16, %cst_12 {dimension_numbers = #tpu.dot_dimension_numbers<[1], [0], [0], [1], [0, 0, 1, 1], [], []>} : vector<8x8xf32>, vector<8x4xf32>, vector<8x4xf32> -> vector<8x4xf32>
    %27 = vector.broadcast %25 : vector<8x1xf32> to vector<8x4xf32>
    %28 = arith.mulf %26, %27 : vector<8x4xf32>
    %29 = vector.extract_strided_slice %11 {offsets = [0, 4], sizes = [8, 4], strides = [1, 1]} : vector<8x32xf32> to vector<8x4xf32>
    %30 = vector.extract_strided_slice %12 {offsets = [0, 4], sizes = [8, 4], strides = [1, 1]} : vector<8x32xf32> to vector<8x4xf32>
    %31 = vector.extract_strided_slice %13 {offsets = [0, 4], sizes = [8, 4], strides = [1, 1]} : vector<8x32xf32> to vector<8x4xf32>
    %cst_13 = arith.constant dense<0.000000e+00> : vector<8x8xf32>
    %32 = tpu.matmul %29, %30, %cst_13 {dimension_numbers = #tpu.dot_dimension_numbers<[1], [1], [0], [0], [0, 0, 1, 0], [], []>} : vector<8x4xf32>, vector<8x4xf32>, vector<8x8xf32> -> vector<8x8xf32>
    %cst_14 = arith.constant dense<0xFF800000> : vector<8xf32>
    %33 = vector.multi_reduction <maximumf>, %32, %cst_14 [1] : vector<8x8xf32> to vector<8xf32>
    %34 = vector.shape_cast %33 : vector<8xf32> to vector<8x1xf32>
    %35 = vector.broadcast %34 : vector<8x1xf32> to vector<8x8xf32>
    %36 = arith.subf %32, %35 : vector<8x8xf32>
    %37 = math.exp %36 : vector<8x8xf32>
    %cst_15 = arith.constant dense<0.000000e+00> : vector<8xf32>
    %38 = vector.multi_reduction <add>, %37, %cst_15 [1] : vector<8x8xf32> to vector<8xf32>
    %39 = vector.shape_cast %38 : vector<8xf32> to vector<8x1xf32>
    %40 = tpu.reciprocal %39 : vector<8x1xf32> -> vector<8x1xf32>
    %cst_16 = arith.constant dense<0.000000e+00> : vector<8x4xf32>
    %41 = tpu.matmul %37, %31, %cst_16 {dimension_numbers = #tpu.dot_dimension_numbers<[1], [0], [0], [1], [0, 0, 1, 1], [], []>} : vector<8x8xf32>, vector<8x4xf32>, vector<8x4xf32> -> vector<8x4xf32>
    %42 = vector.broadcast %40 : vector<8x1xf32> to vector<8x4xf32>
    %43 = arith.mulf %41, %42 : vector<8x4xf32>
    %44 = vector.extract_strided_slice %11 {offsets = [0, 8], sizes = [8, 4], strides = [1, 1]} : vector<8x32xf32> to vector<8x4xf32>
    %45 = vector.extract_strided_slice %12 {offsets = [0, 8], sizes = [8, 4], strides = [1, 1]} : vector<8x32xf32> to vector<8x4xf32>
    %46 = vector.extract_strided_slice %13 {offsets = [0, 8], sizes = [8, 4], strides = [1, 1]} : vector<8x32xf32> to vector<8x4xf32>
    %cst_17 = arith.constant dense<0.000000e+00> : vector<8x8xf32>
    %47 = tpu.matmul %44, %45, %cst_17 {dimension_numbers = #tpu.dot_dimension_numbers<[1], [1], [0], [0], [0, 0, 1, 0], [], []>} : vector<8x4xf32>, vector<8x4xf32>, vector<8x8xf32> -> vector<8x8xf32>
    %cst_18 = arith.constant dense<0xFF800000> : vector<8xf32>
    %48 = vector.multi_reduction <maximumf>, %47, %cst_18 [1] : vector<8x8xf32> to vector<8xf32>
    %49 = vector.shape_cast %48 : vector<8xf32> to vector<8x1xf32>
    %50 = vector.broadcast %49 : vector<8x1xf32> to vector<8x8xf32>
    %51 = arith.subf %47, %50 : vector<8x8xf32>
    %52 = math.exp %51 : vector<8x8xf32>
    %cst_19 = arith.constant dense<0.000000e+00> : vector<8xf32>
    %53 = vector.multi_reduction <add>, %52, %cst_19 [1] : vector<8x8xf32> to vector<8xf32>
    %54 = vector.shape_cast %53 : vector<8xf32> to vector<8x1xf32>
    %55 = tpu.reciprocal %54 : vector<8x1xf32> -> vector<8x1xf32>
    %cst_20 = arith.constant dense<0.000000e+00> : vector<8x4xf32>
    %56 = tpu.matmul %52, %46, %cst_20 {dimension_numbers = #tpu.dot_dimension_numbers<[1], [0], [0], [1], [0, 0, 1, 1], [], []>} : vector<8x8xf32>, vector<8x4xf32>, vector<8x4xf32> -> vector<8x4xf32>
    %57 = vector.broadcast %55 : vector<8x1xf32> to vector<8x4xf32>
    %58 = arith.mulf %56, %57 : vector<8x4xf32>
    %59 = vector.extract_strided_slice %11 {offsets = [0, 12], sizes = [8, 4], strides = [1, 1]} : vector<8x32xf32> to vector<8x4xf32>
    %60 = vector.extract_strided_slice %12 {offsets = [0, 12], sizes = [8, 4], strides = [1, 1]} : vector<8x32xf32> to vector<8x4xf32>
    %61 = vector.extract_strided_slice %13 {offsets = [0, 12], sizes = [8, 4], strides = [1, 1]} : vector<8x32xf32> to vector<8x4xf32>
    %cst_21 = arith.constant dense<0.000000e+00> : vector<8x8xf32>
    %62 = tpu.matmul %59, %60, %cst_21 {dimension_numbers = #tpu.dot_dimension_numbers<[1], [1], [0], [0], [0, 0, 1, 0], [], []>} : vector<8x4xf32>, vector<8x4xf32>, vector<8x8xf32> -> vector<8x8xf32>
    %cst_22 = arith.constant dense<0xFF800000> : vector<8xf32>
    %63 = vector.multi_reduction <maximumf>, %62, %cst_22 [1] : vector<8x8xf32> to vector<8xf32>
    %64 = vector.shape_cast %63 : vector<8xf32> to vector<8x1xf32>
    %65 = vector.broadcast %64 : vector<8x1xf32> to vector<8x8xf32>
    %66 = arith.subf %62, %65 : vector<8x8xf32>
    %67 = math.exp %66 : vector<8x8xf32>
    %cst_23 = arith.constant dense<0.000000e+00> : vector<8xf32>
    %68 = vector.multi_reduction <add>, %67, %cst_23 [1] : vector<8x8xf32> to vector<8xf32>
    %69 = vector.shape_cast %68 : vector<8xf32> to vector<8x1xf32>
    %70 = tpu.reciprocal %69 : vector<8x1xf32> -> vector<8x1xf32>
    %cst_24 = arith.constant dense<0.000000e+00> : vector<8x4xf32>
    %71 = tpu.matmul %67, %61, %cst_24 {dimension_numbers = #tpu.dot_dimension_numbers<[1], [0], [0], [1], [0, 0, 1, 1], [], []>} : vector<8x8xf32>, vector<8x4xf32>, vector<8x4xf32> -> vector<8x4xf32>
    %72 = vector.broadcast %70 : vector<8x1xf32> to vector<8x4xf32>
    %73 = arith.mulf %71, %72 : vector<8x4xf32>
    %74 = vector.extract_strided_slice %11 {offsets = [0, 16], sizes = [8, 4], strides = [1, 1]} : vector<8x32xf32> to vector<8x4xf32>
    %75 = vector.extract_strided_slice %12 {offsets = [0, 16], sizes = [8, 4], strides = [1, 1]} : vector<8x32xf32> to vector<8x4xf32>
    %76 = vector.extract_strided_slice %13 {offsets = [0, 16], sizes = [8, 4], strides = [1, 1]} : vector<8x32xf32> to vector<8x4xf32>
    %cst_25 = arith.constant dense<0.000000e+00> : vector<8x8xf32>
    %77 = tpu.matmul %74, %75, %cst_25 {dimension_numbers = #tpu.dot_dimension_numbers<[1], [1], [0], [0], [0, 0, 1, 0], [], []>} : vector<8x4xf32>, vector<8x4xf32>, vector<8x8xf32> -> vector<8x8xf32>
    %cst_26 = arith.constant dense<0xFF800000> : vector<8xf32>
    %78 = vector.multi_reduction <maximumf>, %77, %cst_26 [1] : vector<8x8xf32> to vector<8xf32>
    %79 = vector.shape_cast %78 : vector<8xf32> to vector<8x1xf32>
    %80 = vector.broadcast %79 : vector<8x1xf32> to vector<8x8xf32>
    %81 = arith.subf %77, %80 : vector<8x8xf32>
    %82 = math.exp %81 : vector<8x8xf32>
    %cst_27 = arith.constant dense<0.000000e+00> : vector<8xf32>
    %83 = vector.multi_reduction <add>, %82, %cst_27 [1] : vector<8x8xf32> to vector<8xf32>
    %84 = vector.shape_cast %83 : vector<8xf32> to vector<8x1xf32>
    %85 = tpu.reciprocal %84 : vector<8x1xf32> -> vector<8x1xf32>
    %cst_28 = arith.constant dense<0.000000e+00> : vector<8x4xf32>
    %86 = tpu.matmul %82, %76, %cst_28 {dimension_numbers = #tpu.dot_dimension_numbers<[1], [0], [0], [1], [0, 0, 1, 1], [], []>} : vector<8x8xf32>, vector<8x4xf32>, vector<8x4xf32> -> vector<8x4xf32>
    %87 = vector.broadcast %85 : vector<8x1xf32> to vector<8x4xf32>
    %88 = arith.mulf %86, %87 : vector<8x4xf32>
    %89 = vector.extract_strided_slice %11 {offsets = [0, 20], sizes = [8, 4], strides = [1, 1]} : vector<8x32xf32> to vector<8x4xf32>
    %90 = vector.extract_strided_slice %12 {offsets = [0, 20], sizes = [8, 4], strides = [1, 1]} : vector<8x32xf32> to vector<8x4xf32>
    %91 = vector.extract_strided_slice %13 {offsets = [0, 20], sizes = [8, 4], strides = [1, 1]} : vector<8x32xf32> to vector<8x4xf32>
    %cst_29 = arith.constant dense<0.000000e+00> : vector<8x8xf32>
    %92 = tpu.matmul %89, %90, %cst_29 {dimension_numbers = #tpu.dot_dimension_numbers<[1], [1], [0], [0], [0, 0, 1, 0], [], []>} : vector<8x4xf32>, vector<8x4xf32>, vector<8x8xf32> -> vector<8x8xf32>
    %cst_30 = arith.constant dense<0xFF800000> : vector<8xf32>
    %93 = vector.multi_reduction <maximumf>, %92, %cst_30 [1] : vector<8x8xf32> to vector<8xf32>
    %94 = vector.shape_cast %93 : vector<8xf32> to vector<8x1xf32>
    %95 = vector.broadcast %94 : vector<8x1xf32> to vector<8x8xf32>
    %96 = arith.subf %92, %95 : vector<8x8xf32>
    %97 = math.exp %96 : vector<8x8xf32>
    %cst_31 = arith.constant dense<0.000000e+00> : vector<8xf32>
    %98 = vector.multi_reduction <add>, %97, %cst_31 [1] : vector<8x8xf32> to vector<8xf32>
    %99 = vector.shape_cast %98 : vector<8xf32> to vector<8x1xf32>
    %100 = tpu.reciprocal %99 : vector<8x1xf32> -> vector<8x1xf32>
    %cst_32 = arith.constant dense<0.000000e+00> : vector<8x4xf32>
    %101 = tpu.matmul %97, %91, %cst_32 {dimension_numbers = #tpu.dot_dimension_numbers<[1], [0], [0], [1], [0, 0, 1, 1], [], []>} : vector<8x8xf32>, vector<8x4xf32>, vector<8x4xf32> -> vector<8x4xf32>
    %102 = vector.broadcast %100 : vector<8x1xf32> to vector<8x4xf32>
    %103 = arith.mulf %101, %102 : vector<8x4xf32>
    %104 = vector.extract_strided_slice %11 {offsets = [0, 24], sizes = [8, 4], strides = [1, 1]} : vector<8x32xf32> to vector<8x4xf32>
    %105 = vector.extract_strided_slice %12 {offsets = [0, 24], sizes = [8, 4], strides = [1, 1]} : vector<8x32xf32> to vector<8x4xf32>
    %106 = vector.extract_strided_slice %13 {offsets = [0, 24], sizes = [8, 4], strides = [1, 1]} : vector<8x32xf32> to vector<8x4xf32>
    %cst_33 = arith.constant dense<0.000000e+00> : vector<8x8xf32>
    %107 = tpu.matmul %104, %105, %cst_33 {dimension_numbers = #tpu.dot_dimension_numbers<[1], [1], [0], [0], [0, 0, 1, 0], [], []>} : vector<8x4xf32>, vector<8x4xf32>, vector<8x8xf32> -> vector<8x8xf32>
    %cst_34 = arith.constant dense<0xFF800000> : vector<8xf32>
    %108 = vector.multi_reduction <maximumf>, %107, %cst_34 [1] : vector<8x8xf32> to vector<8xf32>
    %109 = vector.shape_cast %108 : vector<8xf32> to vector<8x1xf32>
    %110 = vector.broadcast %109 : vector<8x1xf32> to vector<8x8xf32>
    %111 = arith.subf %107, %110 : vector<8x8xf32>
    %112 = math.exp %111 : vector<8x8xf32>
    %cst_35 = arith.constant dense<0.000000e+00> : vector<8xf32>
    %113 = vector.multi_reduction <add>, %112, %cst_35 [1] : vector<8x8xf32> to vector<8xf32>
    %114 = vector.shape_cast %113 : vector<8xf32> to vector<8x1xf32>
    %115 = tpu.reciprocal %114 : vector<8x1xf32> -> vector<8x1xf32>
    %cst_36 = arith.constant dense<0.000000e+00> : vector<8x4xf32>
    %116 = tpu.matmul %112, %106, %cst_36 {dimension_numbers = #tpu.dot_dimension_numbers<[1], [0], [0], [1], [0, 0, 1, 1], [], []>} : vector<8x8xf32>, vector<8x4xf32>, vector<8x4xf32> -> vector<8x4xf32>
    %117 = vector.broadcast %115 : vector<8x1xf32> to vector<8x4xf32>
    %118 = arith.mulf %116, %117 : vector<8x4xf32>
    %119 = vector.extract_strided_slice %11 {offsets = [0, 28], sizes = [8, 4], strides = [1, 1]} : vector<8x32xf32> to vector<8x4xf32>
    %120 = vector.extract_strided_slice %12 {offsets = [0, 28], sizes = [8, 4], strides = [1, 1]} : vector<8x32xf32> to vector<8x4xf32>
    %121 = vector.extract_strided_slice %13 {offsets = [0, 28], sizes = [8, 4], strides = [1, 1]} : vector<8x32xf32> to vector<8x4xf32>
    %cst_37 = arith.constant dense<0.000000e+00> : vector<8x8xf32>
    %122 = tpu.matmul %119, %120, %cst_37 {dimension_numbers = #tpu.dot_dimension_numbers<[1], [1], [0], [0], [0, 0, 1, 0], [], []>} : vector<8x4xf32>, vector<8x4xf32>, vector<8x8xf32> -> vector<8x8xf32>
    %cst_38 = arith.constant dense<0xFF800000> : vector<8xf32>
    %123 = vector.multi_reduction <maximumf>, %122, %cst_38 [1] : vector<8x8xf32> to vector<8xf32>
    %124 = vector.shape_cast %123 : vector<8xf32> to vector<8x1xf32>
    %125 = vector.broadcast %124 : vector<8x1xf32> to vector<8x8xf32>
    %126 = arith.subf %122, %125 : vector<8x8xf32>
    %127 = math.exp %126 : vector<8x8xf32>
    %cst_39 = arith.constant dense<0.000000e+00> : vector<8xf32>
    %128 = vector.multi_reduction <add>, %127, %cst_39 [1] : vector<8x8xf32> to vector<8xf32>
    %129 = vector.shape_cast %128 : vector<8xf32> to vector<8x1xf32>
    %130 = tpu.reciprocal %129 : vector<8x1xf32> -> vector<8x1xf32>
    %cst_40 = arith.constant dense<0.000000e+00> : vector<8x4xf32>
    %131 = tpu.matmul %127, %121, %cst_40 {dimension_numbers = #tpu.dot_dimension_numbers<[1], [0], [0], [1], [0, 0, 1, 1], [], []>} : vector<8x8xf32>, vector<8x4xf32>, vector<8x4xf32> -> vector<8x4xf32>
    %132 = vector.broadcast %130 : vector<8x1xf32> to vector<8x4xf32>
    %133 = arith.mulf %131, %132 : vector<8x4xf32>
    %134 = tpu.concatenate %28, %43, %58, %73, %88, %103, %118, %133 in 1 : vector<8x4xf32>, vector<8x4xf32>, vector<8x4xf32>, vector<8x4xf32>, vector<8x4xf32>, vector<8x4xf32>, vector<8x4xf32>, vector<8x4xf32> -> vector<8x32xf32>
    %c0_41 = arith.constant 0 : index
    %c0_42 = arith.constant 0 : index
    %135 = vector.load %arg8[%c0_41, %c0_42] : memref<8x32xf32, #tpu.memory_space<vmem>>, vector<8x32xf32>
    tpu.vector_store %arg8[%c0_41, %c0_42], %134 {strides = array<i32>} : memref<8x32xf32, #tpu.memory_space<vmem>>, vector<8x32xf32>,
    %c0_i32 = arith.constant 0 : i32
    %136 = arith.cmpi eq, %arg1, %c0_i32 : i32
    %137 = arith.extui %136 : i1 to i32
    %c0_i32_43 = arith.constant 0 : i32
    %138 = arith.cmpi ne, %137, %c0_i32_43 : i32
    scf.if %138 {
      %c0_44 = arith.constant 0 : index
      %c0_45 = arith.constant 0 : index
      %139 = vector.load %arg8[%c0_44, %c0_45] : memref<8x32xf32, #tpu.memory_space<vmem>>, vector<8x32xf32>
      %c0_46 = arith.constant 0 : index
      %c0_47 = arith.constant 0 : index
      %140 = vector.load %arg5[%c0_46, %c0_47] : memref<32x32xf32, #tpu.memory_space<vmem>>, vector<32x32xf32>
      %cst_48 = arith.constant dense<0.000000e+00> : vector<8x32xf32>
      %141 = tpu.matmul %139, %140, %cst_48 {dimension_numbers = #tpu.dot_dimension_numbers<[1], [1], [0], [0], [0, 0, 1, 0], [], []>} : vector<8x32xf32>, vector<32x32xf32>, vector<8x32xf32> -> vector<8x32xf32>
      %c0_49 = arith.constant 0 : index
      %c0_50 = arith.constant 0 : index
      %142 = vector.load %arg6[%c0_49, %c0_50] : memref<1x32xf32, #tpu.memory_space<vmem>>, vector<1x32xf32>
      %143 = vector.broadcast %142 : vector<1x32xf32> to vector<8x32xf32>
      %144 = arith.addf %141, %143 : vector<8x32xf32>
      %c0_51 = arith.constant 0 : index
      %c0_52 = arith.constant 0 : index
      %c0_53 = arith.constant 0 : index
      %145 = vector.load %arg7[%c0_51, %c0_52, %c0_53] : memref<1x8x32xf32, #tpu.memory_space<vmem>>, vector<1x8x32xf32>
      %146 = vector.shape_cast %145 : vector<1x8x32xf32> to vector<8x32xf32>
      %147 = vector.shape_cast %144 : vector<8x32xf32> to vector<1x8x32xf32>
      tpu.vector_store %arg7[%c0_51, %c0_52, %c0_53], %147 {strides = array<i32>} : memref<1x8x32xf32, #tpu.memory_space<vmem>>, vector<1x8x32xf32>,
    } else {
    }
    return
  }
  func.func @transform_0(%arg0: i32, %arg1: i32) -> (i32, i32, i32) {
    %c0_i32 = arith.constant 0 : i32
    %c0_i32_0 = arith.constant 0 : i32
    %c0_i32_1 = arith.constant 0 : i32
    return %arg0, %c0_i32, %c0_i32_0 : i32, i32, i32
  }
  func.func @transform_1(%arg0: i32, %arg1: i32) -> (i32, i32, i32) {
    %c0_i32 = arith.constant 0 : i32
    %c0_i32_0 = arith.constant 0 : i32
    %c0_i32_1 = arith.constant 0 : i32
    return %arg1, %c0_i32, %c0_i32_0 : i32, i32, i32
  }
  func.func @transform_2(%arg0: i32, %arg1: i32) -> (i32, i32, i32) {
    %c0_i32 = arith.constant 0 : i32
    %c0_i32_0 = arith.constant 0 : i32
    %c0_i32_1 = arith.constant 0 : i32
    return %arg1, %c0_i32, %c0_i32_0 : i32, i32, i32
  }
  func.func @transform_3(%arg0: i32, %arg1: i32) -> (i32, i32) {
    %c0_i32 = arith.constant 0 : i32
    %c0_i32_0 = arith.constant 0 : i32
    %c0_i32_1 = arith.constant 0 : i32
    return %c0_i32, %c0_i32_0 : i32, i32
  }
  func.func @transform_4(%arg0: i32, %arg1: i32) -> (i32, i32) {
    %c0_i32 = arith.constant 0 : i32
    %c0_i32_0 = arith.constant 0 : i32
    %c0_i32_1 = arith.constant 0 : i32
    return %c0_i32, %c0_i32_0 : i32, i32
  }
  func.func @transform_5(%arg0: i32, %arg1: i32) -> (i32, i32, i32) {
    %c0_i32 = arith.constant 0 : i32
    %c0_i32_0 = arith.constant 0 : i32
    %c0_i32_1 = arith.constant 0 : i32
    return %arg0, %c0_i32, %c0_i32_0 : i32, i32, i32
  }
}

</mosaic_0001>

<bundles_post_ra>
// kernel: tpu_custom_call.1
= control target key start
LH: loop header
LB: loop body
LE: loop exit
PB: predicated region body
PF: predicated region fallthrough
CT: control target
= control target key end

     0   :  { %10 = vsyncpa [#allocation4], 0  ;;  %s2852_s0 = inlined_call_operand.vmem [shape: f32[2,8,32], index: 0, kind: input, shape index: {}]   ;;  %s2853_s1 = inlined_call_operand.vmem [shape: f32[1,96,32], index: 1, kind: input, shape index: {}]   ;;  %s2854_s2 = inlined_call_operand.vmem [shape: f32[1,1,96], index: 2, kind: input, shape index: {}]   ;;  %s2855_s3 = inlined_call_operand.vmem [shape: f32[32,32], index: 3, kind: input, shape index: {}]   ;;  %s2856_s4 = inlined_call_operand.vmem [shape: f32[1,32], index: 4, kind: input, shape index: {}]   ;;  %s2857_s5 = inlined_call_operand.hbm [shape: f32[2,8,32], index: 5, kind: output, shape index: {}]  }
   0x1   :  { %12 = vsyncpa [#allocation4 + $0x1], 0  ;;  %s2491_s18 = smov 0   ;;  %s2493_s19 = smov 0  }
   0x2   :  { %s2495_s20 = smov 0   ;;  %s2497_s21 = smov 0  }
   0x3   :  { %s2499_s22 = smov 0   ;;  %s2501_s23 = smov 0  }
   0x4 LB: > { %s1970_s24 = sadd.s32 4294967295, %s2425_s23   ;;  %s1971_s25 = sadd.s32 4294967294, %s2425_s23   ;;  %s2425_s23 = sphi %s2501_s23, %s18_s23   ;;  %s2421_s22 = sphi %s2499_s22, %s2866_s22   ;;  %s2417_s21 = sphi %s2497_s21, %s2865_s21   ;;  %s2413_s20 = sphi %s2495_s20, %s2864_s20   ;;  %s2409_s19 = sphi %s2493_s19, %s2863_s19   ;;  %s2405_s18 = sphi %s2491_s18, %s2862_s18  }
   0x5   : > { %s30_s26 = sadd.s32 1, %s2421_s22  ;;  %s157_s27 = sadd.s32 1, %s2413_s20 }
   0x6   : > { %p32_p0 = scmp.ge.s32.totalorder %s30_s26, 2  ;;  %p167_p1 = scmp.ne.s32.totalorder %s2413_s20, %s2409_s19 }
   0x7   : > { %p168_p2 = scmp.eq.s32.totalorder %s1970_s24, 1  ;;  %p173_p3 = scmp.ne.s32.totalorder %s2409_s19, %s2405_s18 }
   0x8   : > { %s2868_s26 = smov (%p32_p0, %s30_s26), 0  ;;  %p174_p5 = scmp.eq.s32.totalorder %s1971_s25, 1 }
   0x9   : > { %p2531_p4 = por %p168_p2, %p167_p1  ;;  %s154_s29 = ssub.s32 %s2421_s22, %s2868_s26 }
   0xa   : > { %p1976_p6 = scmp.ge.s32.totalorder %s2425_s23, 1  ;;  %p155_p7 = scmp.eq.s32.totalorder %s154_s29, 0 }
   0xb   : > { %p2538_p8 = por %p174_p5, %p173_p3  ;;  %p219_p9 = scmp.lt.s32.totalorder %s2425_s23, 3 }
   0xc   : > { %s2544_s6 = scalar_select %p155_p7, %s2413_s20, %s157_s27  }
   0xd   : > { %p220_p10 = pnand %p1976_p6, %p219_p9 }
   0xe   : > { %v267_v0 = vld [vmem:[%s2853_s1] sm:$0xff] (!%p220_p10)  ;;  %v268_v1 = vld [vmem:[%s2853_s1 + $0x8] sm:$0xff] (!%p220_p10)  ;;  %vm286_vm0 = vcmask (!%p220_p10), 261120   ;;  %v2427_v2 = vmov (!%p220_p10), 0.0|0.0   ;;  %vm2428_vm2 = vmmov (!%p220_p10), 0   ;;  %v2429_v5 = vmov (!%p220_p10), 0.0  }
   0xf   : > { %223 = sbr.rel (%p220_p10) target bundleno = 3950 (0xf6e), region = 40  ;;  %2195 = vmatprep.subr.bf16.mxu0 (!%p220_p10), %v2427_v2  ;;  %v2196_v3 = vpack.c.bf16 (!%p220_p10), %v268_v1, %v267_v0  ;;  %vm2555_vm1 = vmpackc.low (!%p220_p10), %vm286_vm0, %vm286_vm0  ;;  %2101 = vmatprep.mubr.msk.f32.mxu0 (!%p220_p10), %vm2428_vm2, %v2429_v5  ;;  %v269_v6 = vld [vmem:[%s2853_s1 + $0x10] sm:$0xff] (!%p220_p10)  ;;  %v270_v7 = vld [vmem:[%s2853_s1 + $0x18] sm:$0xff] (!%p220_p10)  ;;  %p254_p11 = scmp.lt.s32.totalorder (!%p220_p10), %s2417_s21, 1  ;;  %vm400_vm3 = vcmask (!%p220_p10), 31744   ;;  %vm476_vm4 = vcmask (!%p220_p10), 64512  }
  0x10   : > { %2104 = vmatprep.subr.mxu1 (!%p220_p10), %v2429_v5  ;;  %2106 = vmatprep.mubr.msk.f32.mxu1 (!%p220_p10), %vm2428_vm2, %v2429_v5  ;;  %v2200_v8 = vpack.c.bf16 (!%p220_p10), %v270_v7, %v269_v6  ;;  %v271_v9 = vld [vmem:[%s2853_s1 + $0x20] sm:$0xff] (!%p220_p10)  ;;  %v272_v10 = vld [vmem:[%s2853_s1 + $0x28] sm:$0xff] (!%p220_p10)  ;;  %v273_v12 = vld [vmem:[%s2853_s1 + $0x30] sm:$0xff] (!%p220_p10)  ;;  %s2430_s8 = smov (!%p220_p10), 64   ;;  %s2431_s9 = smov (!%p220_p10), 96   ;;  %vm1749_vm5 = vcmask (!%p220_p10), 97280  }
  0x11   : > { %2198 = vmatpush3.bf16.xpose.msk.msra.mxu0 (!%p220_p10), %vm2555_vm1, %v2196_v3  ;;  %v2204_v11 = vpack.c.bf16 (!%p220_p10), %v272_v10, %v271_v9  ;;  %v274_v13 = vld [vmem:[%s2853_s1 + $0x38] sm:$0xff] (!%p220_p10)  ;;  %v275_v15 = vld [vmem:[%s2853_s1 + $0x40] sm:$0xff] (!%p220_p10)  ;;  %v276_v16 = vld [vmem:[%s2853_s1 + $0x48] sm:$0xff] (!%p220_p10)  ;;  %s2432_s10 = smov (!%p220_p10), 92   ;;  %s2433_s11 = smov (!%p220_p10), 124   ;;  %vm1751_vm6 = vcmask (!%p220_p10), 130048  }
  0x12   : > { %2199 = vmatprep.subr.bf16.mxu0 (!%p220_p10), %v2427_v2  ;;  %v2208_v14 = vpack.c.bf16 (!%p220_p10), %v274_v13, %v273_v12  ;;  %v2212_v17 = vpack.c.bf16 (!%p220_p10), %v276_v16, %v275_v15  ;;  %v277_v18 = vld [vmem:[%s2853_s1 + $0x50] sm:$0xff] (!%p220_p10)  ;;  %v278_v19 = vld [vmem:[%s2853_s1 + $0x58] sm:$0xff] (!%p220_p10)  ;;  %v1979_v22 = vld [vmem:[%s2854_s2] ss:$0 sm:$0xff] (!%p220_p10)  ;;  %s2434_s12 = smov (!%p220_p10), 60   ;;  %s2435_s13 = smov (!%p220_p10), 120  }
  0x13   : > { %v2216_v20 = vpack.c.bf16 (!%p220_p10), %v278_v19, %v277_v18  ;;  %s2436_s14 = smov (!%p220_p10), 88   ;;  %s2437_s15 = smov (!%p220_p10), 56   ;;  %vm1753_vm7 = vcmask (!%p220_p10), 162816   ;;  %vm1755_vm8 = vcmask (!%p220_p10), 195584   ;;  %vm1757_vm9 = vcmask (!%p220_p10), 228352  }
  0x14   : > { %s2440_s24 = smov (!%p220_p10), 52   ;;  %s2441_s25 = smov (!%p220_p10), 112  }
  0x15   : > { %s2443_s29 = smov (!%p220_p10), 48   ;;  %s2444_s7 = smov (!%p220_p10), 76  }
  0x16   : > { %s255_s16 = scalar_select %p254_p11, %s2417_s21, 1 }
  0x18   : > { %s1978_s17 = sshll.u32 %s255_s16, 3  ;;  %s2438_s16 = smov 84  }
  0x19   : > { %2202 = vmatpush3.bf16.xpose.msk.msra.mxu0 %vm2555_vm1, %v2200_v8  ;;  %s257_s27 = scalar_lea.vmem %s2852_s0, %s1978_s17  ;;  %s2439_s17 = smov 116  }
  0x1a   : > { %2203 = vmatprep.subr.bf16.mxu0 %v2427_v2  ;;  %v266_v21 = vld [vmem:[%s257_s27] sm:$0xff]  ;;  %s2442_s27 = smov 80  }
  0x21   : > { %2206 = vmatpush3.bf16.xpose.msk.msra.mxu0 %vm2555_vm1, %v2204_v11 }
  0x22   : > { %2207 = vmatprep.subr.bf16.mxu0 %v2427_v2 }
  0x29   : > { %2210 = vmatpush3.bf16.xpose.msk.msra.mxu0 %vm2555_vm1, %v2208_v14 }
  0x2a   : > { %2211 = vmatprep.subr.bf16.mxu0 %v2427_v2 }
  0x31   : > { %2214 = vmatpush3.bf16.xpose.msk.msra.mxu0 %vm2555_vm1, %v2212_v17 }
  0x32   : > { %2215 = vmatprep.subr.bf16.mxu0 %v2427_v2 }
  0x39   : > { %2218 = vmatpush3.bf16.xpose.msk.msra.mxu0 %vm2555_vm1, %v2216_v20 }
  0x3a   : > { %2219 = vmatprep.subr.bf16.mxu0 %v2427_v2 }
  0x40   : > { %2102 = vmatmul.mubr.msk.f32.vlgmr.msra.gmra.mrb[0].mxu0 %vm286_vm0, %v266_v21 }
  0x41   : > { %2192 = vmatprep.mubr.msk.f32.mxu0 %vm2428_vm2, %v2429_v5 }
 0x113   : > { %v392_v23 = vpop.f32.mrb[0].mxu0 }
 0x114   : > { %v2623_v24 = vadd.f32 %v1979_v22, %v392_v23  ;;  %v2103_v25 = vpop.f32.mrb[1].mxu0 }
 0x116   : > { %487 = vrot.lane.b32.xlu1 %v2623_v24, %s2430_s8  ;;  %398 = vrot.lane.b32.xlu0 %v2623_v24, %s2431_s9  ;;  %v2629_v26 = vmul.f32 0.5, %v2623_v24  ;;  %s2445_s8 = smov 108   ;;  %s2446_s9 = smov 44  }
 0x11a   : > { %566 = vrot.lane.b32.xlu1 %v2623_v24, %s2432_s10  ;;  %s2447_s10 = smov 72  }
 0x11e   : > { %564 = vrot.lane.b32.xlu1 %v2629_v26, %s2433_s11  ;;  %s2448_s11 = smov 104  }
 0x188   : > { %v399_v27 = vpop.permute.xlu0 %398  ;;  %v488_v28 = vpop.permute.xlu1 %487 }
 0x189   : > { %2105 = vmatpush3.xpose.msk.msra.mxu1 %vm400_vm3, %v399_v27 }
 0x18a   : > { %2109 = vmatprep.subr.mxu1 %v2429_v5 }
 0x18c   : > { %2107 = vmatmul.mubr.msk.f32.vlgmr.msra.gmra.mrb[0].mxu1 %vm400_vm3, %v2629_v26  ;;  %v567_v35 = vpop.permute.xlu1 %566 }
 0x18d   : > { %2110 = vmatpush3.msra.mxu1 %v488_v28  ;;  %2111 = vmatprep.mubr.msk.f32.mxu1 %vm2428_vm2, %v2429_v5 }
 0x18e   : > { %2114 = vmatprep.subr.mxu1 %v2429_v5 }
 0x190   : > { %v565_v37 = vpop.permute.xlu1 %564 }
 0x25f   : > { %v472_v29 = vpop.f32.mrb[0].mxu1 }
 0x260   : > { %v2108_v30 = vpop.f32.mrb[1].mxu1  ;;  %v477_v31 = vsel %vm476_vm4, %v472_v29, -inf }
 0x261   : > { %478 = vmax.xlane.f32.xlu0 %v477_v31 }
 0x277   : > { %652 = vrot.lane.b32.xlu0 %v2623_v24, %s2434_s12  ;;  %s2449_s12 = smov 40  }
 0x27b   : > { %729 = vrot.lane.b32.xlu0 %v2629_v26, %s2435_s13  ;;  %s2450_s13 = smov 100  }
 0x2ee   : > { %v479_v32 = vpop.xlane.xlu0 %478 }
 0x2ef   : > { %v480_v33 = vsub.f32 %v472_v29, %v479_v32 }
 0x2f1   : > { %v481_v34 = vmul.f32 1.442695, %v480_v33 }
 0x2f2   : > { %v653_v38 = vpop.permute.xlu0 %652 }
 0x2f3   : > { %2315 = vpow2.f32 %v481_v34 }
 0x2f6   : > { %v730_v49 = vpop.permute.xlu0 %729 }
 0x2fd   : > { %v2642_v36 = vpop.eup %2315 }
 0x2fe   : > { %2112 = vmatmul.mubr.msk.f32.vlgmr.msra.gmra.mrb[2].mxu1 %vm476_vm4, %v2642_v36 }
 0x2ff   : > { %2115 = vmatpush3.xpose.msk.msra.mxu1 %vm400_vm3, %v567_v35  ;;  %2116 = vmatprep.mubr.msk.f32.mxu1 %vm2428_vm2, %v2429_v5 }
 0x300   : > { %2119 = vmatprep.subr.mxu1 %v2429_v5 }
 0x302   : > { %2117 = vmatmul.mubr.msk.f32.vlgmr.msra.gmra.mrb[4].mxu1 %vm400_vm3, %v565_v37 }
 0x303   : > { %2120 = vmatpush3.msra.mxu1 %v653_v38  ;;  %2121 = vmatprep.mubr.msk.f32.mxu1 %vm2428_vm2, %v2429_v5 }
 0x304   : > { %2124 = vmatprep.subr.mxu1 %v2429_v5 }
 0x3d1   : > { %v2654_v39 = vpop.f32.mrb[2].mxu1 }
 0x3d2   : > { %v2113_v40 = vpop.f32.mrb[3].mxu1 }
 0x3d5   : > { %v638_v41 = vpop.f32.mrb[4].mxu1 }
 0x3d6   : > { %v2118_v42 = vpop.f32.mrb[5].mxu1  ;;  %v642_v43 = vsel %vm476_vm4, %v638_v41, -inf }
 0x3d7   : > { %643 = vmax.xlane.f32.xlu1 %v642_v43 }
 0x3e8   : > { %731 = vrot.lane.b32.xlu1 %v2623_v24, %s2436_s14  ;;  %s2451_s14 = smov 68  }
 0x3ec   : > { %817 = vrot.lane.b32.xlu1 %v2623_v24, %s2437_s15  ;;  %s2452_s15 = smov 36  }
 0x3f0   : > { %896 = vrot.lane.b32.xlu1 %v2623_v24, %s2438_s16  ;;  %s2453_s16 = smov 8  }
 0x3f4   : > { %894 = vrot.lane.b32.xlu1 %v2629_v26, %s2439_s17  ;;  %s2454_s17 = smov 12  }
 0x464   : > { %v644_v44 = vpop.xlane.xlu1 %643 }
 0x465   : > { %v645_v45 = vsub.f32 %v638_v41, %v644_v44 }
 0x467   : > { %v646_v46 = vmul.f32 1.442695, %v645_v45 }
 0x468   : > { %v732_v47 = vpop.permute.xlu1 %731 }
 0x469   : > { %2317 = vpow2.f32 %v646_v46 }
 0x46c   : > { %v818_v50 = vpop.permute.xlu1 %817 }
 0x470   : > { %v897_v59 = vpop.permute.xlu1 %896 }
 0x473   : > { %v2661_v48 = vpop.eup %2317 }
 0x474   : > { %2122 = vmatmul.mubr.msk.f32.vlgmr.msra.gmra.mrb[6].mxu1 %vm476_vm4, %v2661_v48  ;;  %v895_v61 = vpop.permute.xlu1 %894  ;;  %v648_v46 = vsel %vm476_vm4, %v2661_v48, 0.0 }
 0x475   : > { %2125 = vmatpush3.xpose.msk.msra.mxu1 %vm400_vm3, %v732_v47  ;;  %2126 = vmatprep.mubr.msk.f32.mxu1 %vm2428_vm2, %v2429_v5  ;;  %v483_v47 = vsel %vm476_vm4, %v2642_v36, 0.0 }
 0x476   : > { %2129 = vmatprep.subr.mxu1 %v2429_v5 }
 0x478   : > { %2127 = vmatmul.mubr.msk.f32.vlgmr.msra.gmra.mrb[8].mxu1 %vm400_vm3, %v730_v49 }
 0x479   : > { %2130 = vmatpush3.msra.mxu1 %v818_v50  ;;  %2131 = vmatprep.mubr.msk.f32.mxu1 %vm2428_vm2, %v2429_v5 }
 0x47a   : > { %2134 = vmatprep.subr.mxu1 %v2429_v5 }
 0x547   : > { %v2673_v51 = vpop.f32.mrb[6].mxu1 }
 0x548   : > { %v2123_v52 = vpop.f32.mrb[7].mxu1 }
 0x54b   : > { %v803_v53 = vpop.f32.mrb[8].mxu1 }
 0x54c   : > { %v2128_v54 = vpop.f32.mrb[9].mxu1  ;;  %v807_v55 = vsel %vm476_vm4, %v803_v53, -inf }
 0x54d   : > { %808 = vmax.xlane.f32.xlu0 %v807_v55 }
 0x563   : > { %982 = vrot.lane.b32.xlu0 %v2623_v24, %s2440_s24  ;;  %s2455_s24 = smov 20  }
 0x567   : > { %1059 = vrot.lane.b32.xlu0 %v2629_v26, %s2441_s25  ;;  %s2456_s25 = smov 4  }
 0x5da   : > { %v809_v56 = vpop.xlane.xlu0 %808 }
 0x5db   : > { %v810_v57 = vsub.f32 %v803_v53, %v809_v56 }
 0x5dd   : > { %v811_v58 = vmul.f32 1.442695, %v810_v57 }
 0x5de   : > { %v983_v62 = vpop.permute.xlu0 %982 }
 0x5df   : > { %2319 = vpow2.f32 %v811_v58 }
 0x5e2   : > { %v1060_v12 = vpop.permute.xlu0 %1059 }
 0x5e9   : > { %v2678_v60 = vpop.eup %2319 }
 0x5ea   : > { %2132 = vmatmul.mubr.msk.f32.vlgmr.msra.gmra.mrb[10].mxu1 %vm476_vm4, %v2678_v60 }
 0x5eb   : > { %2135 = vmatpush3.xpose.msk.msra.mxu1 %vm400_vm3, %v897_v59  ;;  %2136 = vmatprep.mubr.msk.f32.mxu1 %vm2428_vm2, %v2429_v5  ;;  %v813_v59 = vsel %vm476_vm4, %v2678_v60, 0.0 }
 0x5ec   : > { %2139 = vmatprep.subr.mxu1 %v2429_v5 }
 0x5ee   : > { %2137 = vmatmul.mubr.msk.f32.vlgmr.msra.gmra.mrb[12].mxu1 %vm400_vm3, %v895_v61 }
 0x5ef   : > { %2140 = vmatpush3.msra.mxu1 %v983_v62  ;;  %2141 = vmatprep.mubr.msk.f32.mxu1 %vm2428_vm2, %v2429_v5 }
 0x5f0   : > { %2144 = vmatprep.subr.mxu1 %v2429_v5 }
 0x6bd   : > { %v2690_v63 = vpop.f32.mrb[10].mxu1 }
 0x6be   : > { %v2133_v0 = vpop.f32.mrb[11].mxu1 }
 0x6c1   : > { %v968_v1 = vpop.f32.mrb[12].mxu1 }
 0x6c2   : > { %v2138_v3 = vpop.f32.mrb[13].mxu1  ;;  %v972_v6 = vsel %vm476_vm4, %v968_v1, -inf }
 0x6c3   : > { %973 = vmax.xlane.f32.xlu1 %v972_v6 }
 0x6d4   : > { %1061 = vrot.lane.b32.xlu1 %v2623_v24, %s2442_s27  ;;  %s2457_s27 = smov 16  }
 0x6d8   : > { %1147 = vrot.lane.b32.xlu1 %v2623_v24, %s2443_s29  ;;  %s2458_s29 = smov 24  }
 0x6dc   : > { %1226 = vrot.lane.b32.xlu1 %v2623_v24, %s2444_s7 }
 0x6e0   : > { %1224 = vrot.lane.b32.xlu1 %v2629_v26, %s2445_s8 }
 0x750   : > { %v974_v7 = vpop.xlane.xlu1 %973 }
 0x751   : > { %v975_v8 = vsub.f32 %v968_v1, %v974_v7 }
 0x753   : > { %v976_v9 = vmul.f32 1.442695, %v975_v8 }
 0x754   : > { %v1062_v10 = vpop.permute.xlu1 %1061 }
 0x755   : > { %2321 = vpow2.f32 %v976_v9 }
 0x758   : > { %v1148_v13 = vpop.permute.xlu1 %1147 }
 0x75c   : > { %v1227_v22 = vpop.permute.xlu1 %1226 }
 0x75f   : > { %v2697_v11 = vpop.eup %2321 }
 0x760   : > { %2142 = vmatmul.mubr.msk.f32.vlgmr.msra.gmra.mrb[14].mxu1 %vm476_vm4, %v2697_v11  ;;  %v1225_v25 = vpop.permute.xlu1 %1224  ;;  %v978_v61 = vsel %vm476_vm4, %v2697_v11, 0.0 }
 0x761   : > { %2145 = vmatpush3.xpose.msk.msra.mxu1 %vm400_vm3, %v1062_v10  ;;  %2146 = vmatprep.mubr.msk.f32.mxu1 %vm2428_vm2, %v2429_v5 }
 0x762   : > { %2149 = vmatprep.subr.mxu1 %v2429_v5 }
 0x764   : > { %2147 = vmatmul.mubr.msk.f32.vlgmr.msra.gmra.mrb[16].mxu1 %vm400_vm3, %v1060_v12 }
 0x765   : > { %2150 = vmatpush3.msra.mxu1 %v1148_v13  ;;  %2151 = vmatprep.mubr.msk.f32.mxu1 %vm2428_vm2, %v2429_v5 }
 0x766   : > { %2154 = vmatprep.subr.mxu1 %v2429_v5 }
 0x833   : > { %v2709_v14 = vpop.f32.mrb[14].mxu1 }
 0x834   : > { %v2143_v15 = vpop.f32.mrb[15].mxu1 }
 0x837   : > { %v1133_v16 = vpop.f32.mrb[16].mxu1 }
 0x838   : > { %v2148_v17 = vpop.f32.mrb[17].mxu1  ;;  %v1137_v18 = vsel %vm476_vm4, %v1133_v16, -inf }
 0x839   : > { %1138 = vmax.xlane.f32.xlu0 %v1137_v18 }
 0x84f   : > { %1312 = vrot.lane.b32.xlu0 %v2623_v24, %s2446_s9 }
 0x853   : > { %1391 = vrot.lane.b32.xlu0 %v2623_v24, %s2447_s10 }
 0x857   : > { %1389 = vrot.lane.b32.xlu0 %v2629_v26, %s2448_s11 }
 0x85b   : > { %1477 = vrot.lane.b32.xlu0 %v2623_v24, %s2449_s12 }
 0x85f   : > { %1554 = vrot.lane.b32.xlu0 %v2629_v26, %s2450_s13 }
 0x8c6   : > { %v1139_v19 = vpop.xlane.xlu0 %1138 }
 0x8c7   : > { %v1140_v20 = vsub.f32 %v1133_v16, %v1139_v19 }
 0x8c9   : > { %v1141_v21 = vmul.f32 1.442695, %v1140_v20 }
 0x8ca   : > { %v1313_v27 = vpop.permute.xlu0 %1312 }
 0x8cb   : > { %2323 = vpow2.f32 %v1141_v21 }
 0x8ce   : > { %v1392_v35 = vpop.permute.xlu0 %1391 }
 0x8d2   : > { %v1390_v37 = vpop.permute.xlu0 %1389 }
 0x8d5   : > { %v2717_v23 = vpop.eup %2323 }
 0x8d6   : > { %2152 = vmatmul.mubr.msk.f32.vlgmr.msra.gmra.mrb[18].mxu1 %vm476_vm4, %v2717_v23  ;;  %v1478_v40 = vpop.permute.xlu0 %1477  ;;  %v1143_v62 = vsel %vm476_vm4, %v2717_v23, 0.0 }
 0x8d7   : > { %2155 = vmatpush3.xpose.msk.msra.mxu1 %vm400_vm3, %v1227_v22  ;;  %2156 = vmatprep.mubr.msk.f32.mxu1 %vm2428_vm2, %v2429_v5 }
 0x8d8   : > { %2159 = vmatprep.subr.mxu1 %v2429_v5 }
 0x8da   : > { %2157 = vmatmul.mubr.msk.f32.vlgmr.msra.gmra.mrb[20].mxu1 %vm400_vm3, %v1225_v25 }
 0x8db   : > { %2160 = vmatpush3.msra.mxu1 %v1313_v27  ;;  %2161 = vmatprep.mubr.msk.f32.mxu1 %vm2428_vm2, %v2429_v5  ;;  %v1765_v27 = vld [vmem:[%s2855_s3] sm:$0xff] }
 0x8dc   : > { %2164 = vmatprep.subr.mxu1 %v2429_v5 }
 0x9a9   : > { %v2729_v26 = vpop.f32.mrb[18].mxu1 }
 0x9aa   : > { %v2153_v28 = vpop.f32.mrb[19].mxu1 }
 0x9ab   : > { %v1766_v28 = vld [vmem:[%s2855_s3 + $0x8] sm:$0xff] }
 0x9ad   : > { %v1298_v29 = vpop.f32.mrb[20].mxu1 }
 0x9ae   : > { %v2158_v30 = vpop.f32.mrb[21].mxu1  ;;  %v1302_v31 = vsel %vm476_vm4, %v1298_v29, -inf }
 0x9af   : > { %1303 = vmax.xlane.f32.xlu1 %v1302_v31  ;;  %v1768_v30 = vld [vmem:[%s2855_s3 + $0x18] sm:$0xff] }
 0xa3c   : > { %v1304_v32 = vpop.xlane.xlu1 %1303 }
 0xa3d   : > { %v1305_v33 = vsub.f32 %v1298_v29, %v1304_v32  ;;  %v1767_v29 = vld [vmem:[%s2855_s3 + $0x10] sm:$0xff] }
 0xa3e   : > { %v2224_v31 = vpack.c.bf16 %v1768_v30, %v1767_v29 }
 0xa3f   : > { %v1306_v34 = vmul.f32 1.442695, %v1305_v33 }
 0xa41   : > { %2325 = vpow2.f32 %v1306_v34 }
 0xa4b   : > { %v2326_v38 = vpop.eup %2325 }
 0xa4c   : > { %2162 = vmatmul.mubr.msk.f32.vlgmr.msra.gmra.mrb[22].mxu1 %vm476_vm4, %v2326_v38 }
 0xa4d   : > { %2165 = vmatpush3.xpose.msk.msra.mxu1 %vm400_vm3, %v1392_v35  ;;  %2166 = vmatprep.mubr.msk.f32.mxu1 %vm2428_vm2, %v2429_v5 }
 0xa4e   : > { %2169 = vmatprep.subr.mxu1 %v2429_v5 }
 0xa50   : > { %2167 = vmatmul.mubr.msk.f32.vlgmr.msra.gmra.mrb[24].mxu1 %vm400_vm3, %v1390_v37 }
 0xa51   : > { %2170 = vmatpush3.msra.mxu1 %v1478_v40  ;;  %2171 = vmatprep.mubr.msk.f32.mxu1 %vm2428_vm2, %v2429_v5 }
 0xa52   : > { %2174 = vmatprep.subr.mxu1 %v2429_v5 }
 0xb1f   : > { %v2741_v41 = vpop.f32.mrb[22].mxu1 }
 0xb20   : > { %v2163_v42 = vpop.f32.mrb[23].mxu1 }
 0xb23   : > { %v1463_v43 = vpop.f32.mrb[24].mxu1 }
 0xb24   : > { %v2168_v44 = vpop.f32.mrb[25].mxu1  ;;  %v1467_v45 = vsel %vm476_vm4, %v1463_v43, -inf }
 0xb25   : > { %1468 = vmax.xlane.f32.xlu1 %v1467_v45 }
 0xb36   : > { %1556 = vrot.lane.b32.xlu1 %v2623_v24, %s2451_s14 }
 0xb3a   : > { %1642 = vrot.lane.b32.xlu1 %v2623_v24, %s2452_s15  ;;  %v1555_v24 = vpop.permute.xlu0 %1554  ;;  %s2459_s15 = smov 28  }
 0xb5e   : > { %649 = vadd.xlane.f32.xlu1 %v648_v46 }
 0xb62   : > { %484 = vadd.xlane.f32.xlu1 %v483_v47 }
 0xbb2   : > { %v1469_v49 = vpop.xlane.xlu1 %1468 }
 0xbb3   : > { %v1470_v50 = vsub.f32 %v1463_v43, %v1469_v49 }
 0xbb5   : > { %v1471_v52 = vmul.f32 1.442695, %v1470_v50 }
 0xbb6   : > { %v1557_v53 = vpop.permute.xlu1 %1556 }
 0xbb7   : > { %2327 = vpow2.f32 %v1471_v52 }
 0xbba   : > { %v1643_v48 = vpop.permute.xlu1 %1642 }
 0xbc1   : > { %v2328_v54 = vpop.eup %2327 }
 0xbc2   : > { %2172 = vmatmul.mubr.msk.f32.vlgmr.msra.gmra.mrb[26].mxu1 %vm476_vm4, %v2328_v54  ;;  %v1473_v0 = vsel %vm476_vm4, %v2328_v54, 0.0 }
 0xbc3   : > { %2175 = vmatpush3.xpose.msk.msra.mxu1 %vm400_vm3, %v1557_v53  ;;  %2176 = vmatprep.mubr.msk.f32.mxu1 %vm2428_vm2, %v2429_v5 }
 0xbc4   : > { %2179 = vmatprep.subr.mxu1 %v2429_v5 }
 0xbc6   : > { %2177 = vmatmul.mubr.msk.f32.vlgmr.msra.gmra.mrb[28].mxu1 %vm400_vm3, %v1555_v24  ;;  %v2017_v24 = vld [vmem:[%s2856_s4] ss:$0 sm:$0xff] }
 0xbc7   : > { %2180 = vmatpush3.msra.mxu1 %v1643_v48  ;;  %2181 = vmatprep.mubr.msk.f32.mxu1 %vm2428_vm2, %v2429_v5  ;;  %v1308_v5 = vsel %vm476_vm4, %v2326_v38, 0.0 }
 0xbeb   : > { %v650_v17 = vpop.xlane.xlu1 %649 }
 0xc95   : > { %v1549_v36 = vpop.f32.mrb[26].mxu1 }
 0xc96   : > { %v2173_v55 = vpop.f32.mrb[27].mxu1 }
 0xc99   : > { %v1628_v56 = vpop.f32.mrb[28].mxu1 }
 0xc9a   : > { %v2178_v57 = vpop.f32.mrb[29].mxu1  ;;  %v1632_v58 = vsel %vm476_vm4, %v1628_v56, -inf }
 0xc9b   : > { %1633 = vmax.xlane.f32.xlu0 %v1632_v58 }
 0xc9f   : > { %814 = vadd.xlane.f32.xlu0 %v813_v59 }
 0xca3   : > { %979 = vadd.xlane.f32.xlu0 %v978_v61 }
 0xca7   : > { %1144 = vadd.xlane.f32.xlu0 %v1143_v62 }
 0xcab   : > { %1309 = vadd.xlane.f32.xlu0 %v1308_v5 }
 0xcaf   : > { %1474 = vadd.xlane.f32.xlu0 %v1473_v0 }
 0xd28   : > { %v1634_v1 = vpop.xlane.xlu0 %1633 }
 0xd29   : > { %v1635_v3 = vsub.f32 %v1628_v56, %v1634_v1 }
 0xd2b   : > { %v1636_v6 = vmul.f32 1.442695, %v1635_v3 }
 0xd2c   : > { %v815_v7 = vpop.xlane.xlu0 %814 }
 0xd2d   : > { %2329 = vpow2.f32 %v1636_v6 }
 0xd2e   : > { %2331 = vrcp.f32 %v815_v7 }
 0xd30   : > { %v980_v60 = vpop.xlane.xlu0 %979 }
 0xd31   : > { %2333 = vrcp.f32 %v980_v60 }
 0xd34   : > { %v1145_v8 = vpop.xlane.xlu0 %1144 }
 0xd37   : > { %v2330_v9 = vpop.eup %2329 }
 0xd38   : > { %v2332_v10 = vpop.eup %2331  ;;  %2182 = vmatmul.mubr.msk.f32.vlgmr.msra.gmra.mrb[30].mxu1 %vm476_vm4, %v2330_v9  ;;  %v1310_v11 = vpop.xlane.xlu0 %1309  ;;  %v1638_v12 = vsel %vm476_vm4, %v2330_v9, 0.0 }
 0xd39   : > { %2335 = vrcp.f32 %v1310_v11  ;;  %1639 = vadd.xlane.f32.xlu0 %v1638_v12  ;;  %v893_v13 = vmul.f32 %v2332_v10, %v2690_v63 }
 0xd3a   : > { %2337 = vrcp.f32 %v650_v17 }
 0xd3b   : > { %v2334_v15 = vpop.eup %2333  ;;  %1724 = vrot.lane.b32.xlu1 %v893_v13, %s2453_s16  ;;  %2339 = vrcp.f32 %v1145_v8  ;;  %s251_s16 = sand.u32 1, %s2409_s19  }
 0xd3c   : > { %v1058_v16 = vmul.f32 %v2334_v15, %v2709_v14  ;;  %v1475_v20 = vpop.xlane.xlu0 %1474  ;;  %s1863_s11 = scalar_lea.sflag [#allocation4], %s251_s16 }
 0xd3d   : > { %2341 = vrcp.f32 %v1475_v20 }
 0xd3f   : > { %1728 = vrot.lane.b32.xlu1 %v1058_v16, %s2454_s17  ;;  %s1977_s17 = sshll.u32 %s251_s16, 3 }
 0xd43   : > { %v2336_v18 = vpop.eup %2335 }
 0xd44   : > { %v1388_v19 = vmul.f32 %v2336_v18, %v2741_v41  ;;  %v2338_v21 = vpop.eup %2337 }
 0xd45   : > { %v728_v63 = vmul.f32 %v2338_v21, %v2673_v51  ;;  %v2340_v22 = vpop.eup %2339  ;;  %v2220_v51 = vpack.c.bf16 %v1766_v28, %v1765_v27 }
 0xd46   : > { %1736 = vrot.lane.b32.xlu1 %v1388_v19, %s2455_s24  ;;  %v1223_v14 = vmul.f32 %v2340_v22, %v2729_v26 }
 0xd47   : > { %v2342_v23 = vpop.eup %2341  ;;  %2222 = vmatpush3.bf16.xpose.msk.msra.mxu0 %vm2555_vm1, %v2220_v51 }
 0xd48   : > { %v1553_v25 = vmul.f32 %v2342_v23, %v1549_v36  ;;  %2223 = vmatprep.subr.bf16.mxu0 %v2427_v2  ;;  %v485_v2 = vpop.xlane.xlu1 %484 }
 0xd4f   : > { %1720 = vrot.lane.b32.xlu0 %v728_v63, %s2456_s25  ;;  %2226 = vmatpush3.bf16.xpose.msk.msra.mxu0 %vm2555_vm1, %v2224_v31 }
 0xd53   : > { %1732 = vrot.lane.b32.xlu0 %v1223_v14, %s2457_s27  ;;  %s2024_s27 = sshll.u32 %s2417_s21, 7  ;;  %s2460_s21 = smov [#allocation3]  }
 0xd54   : > { %s2804_s10 = scalar_lea.hbm %s2857_s5, %s2024_s27  ;;  %s2351_s13 = sshll.u32 %s2460_s21, 4  ;;  %s2352_s13 = int_to_ptr.vmem [resolvable:$false] %s2351_s13 }
 0xd55   : > { %s2353_s14 = scalar_lea.vmem %s2352_s13, 256 }
 0xd57   : > { %1740 = vrot.lane.b32.xlu0 %v1553_v25, %s2458_s29  ;;  %s253_s29 = scalar_lea.vmem [#allocation3], %s1977_s17 }
 0xd58   : > { %s1876_s7 = sshll.u32 %s253_s29, 4  ;;  %s2806_s7 = int_to_ptr.vmem [resolvable:$true] %s1876_s7 }
 0xd59   : > { %s2347_s12 = scalar_lea.vmem %s2806_s7, 128  ;;  %p2354_p1 = scmp.lt.s32.totalorder %s2806_s7, %s2352_s13 }
 0xd5a   : > { %p2348_p12 = scmp.ne.s32.totalorder %s2806_s7, %s2347_s12  ;;  %p2355_p2 = scmp.lt.s32.totalorder %s2353_s14, %s2347_s12 }
 0xd5c   : > { %p2349_p13 = pnand %p2348_p12, %p2531_p4  ;;  %p2356_p3 = por %p2355_p2, %p2354_p1 }
 0xd5e   : > { %p2350_p0 = pneg %p2349_p13 }
 0xd60   : > { %p2357_p5 = pnand %p2356_p3, %p2350_p0 }
 0xdad   : > { %v1725_v41 = vpop.permute.xlu1 %1724 }
 0xdb1   : > { %v1729_v44 = vpop.permute.xlu1 %1728 }
 0xdb8   : > { %v1737_v46 = vpop.permute.xlu1 %1736 }
 0xdc6   : > { %v1640_v26 = vpop.xlane.xlu0 %1639 }
 0xdc7   : > { %2343 = vrcp.f32 %v1640_v26 }
 0xdc8   : > { %2345 = vrcp.f32 %v485_v2 }
 0xdca   : > { %v1721_v38 = vpop.permute.xlu0 %1720 }
 0xdce   : > { %v1733_v4 = vpop.permute.xlu0 %1732 }
 0xdd1   : > { %v2344_v32 = vpop.eup %2343 }
 0xdd2   : > { %v2346_v37 = vpop.eup %2345  ;;  %v1741_v49 = vpop.permute.xlu0 %1740 }
 0xdd3   : > { %v563_v40 = vmul.f32 %v2346_v37, %v2654_v39 }
 0xdd5   : > { %v1747_v42 = vsel %vm400_vm3, %v563_v40, %v1721_v38 }
 0xdd6   : > { %v1748_v43 = vsel %vm476_vm4, %v1747_v42, %v1725_v41 }
 0xdd7   : > { %v1750_v45 = vsel %vm1749_vm5, %v1748_v43, %v1729_v44 }
 0xdd8   : > { %v1752_v47 = vsel %vm1751_vm6, %v1750_v45, %v1733_v4 }
 0xdd9   : > { %v1754_v50 = vsel %vm1753_vm7, %v1752_v47, %v1737_v46 }
 0xdda   : > { %v1756_v39 = vsel %vm1755_vm8, %v1754_v50, %v1741_v49 }
 0xe0b   : > { %v1714_v33 = vpop.f32.mrb[30].mxu1 }
 0xe0c   : > { %v1718_v34 = vmul.f32 %v2344_v32, %v1714_v33  ;;  %v2183_v35 = vpop.f32.mrb[31].mxu1 }
 0xe0e   : > { %1744 = vrot.lane.b32.xlu1 %v1718_v34, %s2459_s15 }
 0xe80   : > { %v1745_v52 = vpop.permute.xlu1 %1744 }
 0xe81   : > { %v1758_v53 = vsel %vm1757_vm9, %v1756_v39, %v1745_v52 }
 0xe82   : > { %1759 = vst.msk [vmem:[#allocation2] sm:$0xff] %vm286_vm0, %v1758_v53 }
 0xe89   : > { %v1764_v54 = vld [vmem:[#allocation2] sm:$0xff] }
 0xe8a   : > { %2193 = vmatmul.mubr.msk.f32.vlgmr.msra.gmra.mrb[2].mxu0 %vm286_vm0, %v1764_v54 }
 0xf5d   : > { %v1857_v48 = vpop.f32.mrb[2].mxu0 }
 0xf5e   : > { %v1858_v36 = vadd.f32 %v2017_v24, %v1857_v48  ;;  %v2194_v55 = vpop.f32.mrb[3].mxu0 }
 0xf60   : > { %1861 = vst.msk [vmem:[%s253_s29] sm:$0xff] %vm286_vm0, %v1858_v36 }
 0xf61   : > { %2360 = shalt.err (!%p2357_p5)
}
 0xf62   : > { %s2361_s15 = scalar_lea.hbm %s2804_s10, 128  ;;  %s2365_s24 = scalar_lea.hbm %s2857_s5, 256 }
 0xf63   : > { %p2362_p6 = scmp.ne.s32.totalorder %s2804_s10, %s2361_s15  ;;  %p2366_p10 = scmp.lt.u32.totalorder %s2804_s10, %s2857_s5 }
 0xf64   : > { %p2367_p11 = scmp.lt.u32.totalorder %s2365_s24, %s2361_s15  ;;  %p2369_p13 = scmp.lt.u32.totalorder %s2361_s15, %s2804_s10 }
 0xf65   : > { %p2363_p7 = pnand %p2362_p6, %p2531_p4 }
 0xf66   : > { %p2368_p12 = por %p2367_p11, %p2366_p10 }
 0xf67   : > { %p2364_p9 = pneg %p2363_p7 }
 0xf68   : > { %p2370_p0 = por %p2369_p13, %p2368_p12 }
 0xf6a   : > { %p2371_p1 = pnand %p2370_p0, %p2364_p9 }
 0xf6c   : > { %2374 = shalt.err (!%p2371_p1)
}
 0xf6d   : > { %2227 = dma.vmem_to_hbm [thread:$0]  (%p2531_p4), %s2806_s7, 128, %s2804_s10, %s1863_s11  }
 0xf6e PF: > { %p2233_p2 = scmp.ge.s32.totalorder %s2425_s23, 2  ;;  %s1888_s29 = sand.u32 1, %s2405_s18  }
 0xf6f   : > { %s1889_s8 = scalar_lea.sflag [#allocation4], %s1888_s29 }
 0xf70   : > { %p2230_p3 = pnand %p2233_p2, %p2538_p8 }
 0xf72   : > { %2400 = dma.done.wait (!%p2230_p3), %s1889_s8, 128  }
 0xf73   : > { %2402 = vsyncadd (!%p2230_p3), %s1889_s8, 4294967168  ;;  %s18_s23 = sadd.s32 1, %s2425_s23   ;;  %s2862_s18 = smov %s2409_s19 }
 0xf74   : > { %p15_p5 = scmp.ge.s32.totalorder %s18_s23, 4   ;;  %s2863_s19 = smov %s2413_s20 }
 0xf75   : > { %s2864_s20 = smov %s2544_s6  ;;  %s2865_s21 = smov %s2421_s22 }
 0xf76   : > { %s2866_s22 = smov %s2868_s26  ;;  %17 = sbr.rel (!%p15_p5) target bundleno = 4 (0x4), region = 85 }
 0xf7d   :  { %1894 = vsyncpa [#allocation4], 1 }
 0xf7e   :  { %1896 = vsyncpa [#allocation4 + $0x1], 1 }

</bundles_post_ra>
